<compile_context>
chip_gen: v6e
topology: v6e:2x2x1
jax: 0.10.0
libtpu: 0.0.40
codegen_flags: <defaults>
</compile_context>

<pallas_src>
import math
import functools

import jax
import jax.numpy as jnp
from jax.experimental import pallas as pl
from jax.experimental.pallas import tpu as pltpu


# ----------------------------------------------------------------------------
# Parameter setup (glue): sinusoidal positional-encoding table.
# ----------------------------------------------------------------------------
def make_pe_table(max_len: int, d_model: int) -> jnp.ndarray:
    """Returns pe of shape (max_len, 1, d_model), float32 (matches the torch buffer)."""
    position = jnp.arange(max_len, dtype=jnp.float32)[:, None]          # (L, 1)
    div_term = jnp.exp(
        jnp.arange(0, d_model, 2, dtype=jnp.float32)
        * (-math.log(10000.0) / d_model)
    )                                                                    # (D/2,)
    ang = position * div_term                                            # (L, D/2)
    pe = jnp.zeros((max_len, d_model), dtype=jnp.float32)
    pe = pe.at[:, 0::2].set(jnp.sin(ang))
    pe = pe.at[:, 1::2].set(jnp.cos(ang))
    return pe[:, None, :]                                                # (L, 1, D)


# ----------------------------------------------------------------------------
# Pallas kernels.  x/out blocks are lane-dense (tile_s, B*D); pe block is the
# small (tile_s, D) stream, replicated across the batch in-register.
# ----------------------------------------------------------------------------
def _bcast_pe(pe_tile, B):
    # x.reshape(S, B*D) stores element (b, d) at lane b*D + d, so the pe row
    # just repeats B times along lanes.  Lane concat is XLU/VPU work that
    # hides completely under the DMA — it never touches HBM.
    return pe_tile if B == 1 else jnp.concatenate([pe_tile] * B, axis=-1)


def _pe_add_kernel(x_ref, pe_ref, o_ref, *, B):
    # eval-mode forward: dropout is identity
    o_ref[...] = (x_ref[...] + _bcast_pe(pe_ref[...], B)).astype(o_ref.dtype)


def _uniform23(h):
    """lowbias32-style mixer on int32 (wrapping mul, logical-shift emulated via
    arithmetic shift + mask).  Returns well-mixed int32 uniform in [0, 2**23)."""
    M1 = 0x7FEB352D            # fits int32
    M2 = -2073319797           # int32 two's-complement view of 0x846CA68B
    h = (h ^ ((h >> 16) & 0xFFFF)) * M1
    h = (h ^ ((h >> 15) & 0x1FFFF)) * M2
    h = h ^ ((h >> 16) & 0xFFFF)
    return (h >> 9) & 0x7FFFFF


def _pe_add_dropout_kernel(seed_ref, x_ref, pe_ref, o_ref, *,
                           B, BD, tile_s, threshold, scale):
    # training-mode forward: inverted dropout, counter-based in-kernel PRNG.
    # Note: the add / scale happen in x.dtype (bf16-safe, halves HBM traffic
    # for bf16 models); slight precision loss vs f32 accumulate is fine here.
    y = x_ref[...] + _bcast_pe(pe_ref[...], B)

    # Tiling-invariant mask: hash(absolute element index, seed).  Pure int32
    # jnp ops (no pltpu.prng_*), so it also runs under interpret mode, and the
    # drop pattern does not change if tile_s / grid are re-tuned per chip.
    row0 = pl.program_id(0) * tile_s
    rows = jax.lax.broadcasted_iota(jnp.int32, y.shape, 0) + row0
    cols = jax.lax.broadcasted_iota(jnp.int32, y.shape, 1)
    h0 = (rows * BD + cols) ^ (seed_ref[0] * 0x61C88647)     # fold seed in
    r = _uniform23(h0)
    keep = r >= threshold                                     # P(keep) = 1 - p
    o_ref[...] = jnp.where(keep, y * scale, 0.0).astype(o_ref.dtype)


# ----------------------------------------------------------------------------
# Wrapper
# ----------------------------------------------------------------------------
def _round_up(a: int, m: int) -> int:
    return (a + m - 1) // m * m


def positional_encoding_forward(x, pe, *, p=0.1, training=False, seed=0,
                                tile_s=None,
                                block_bytes_target=4 * 1024 * 1024,
                                donate_x=False):
    """x: (S, B, D); pe: (max_len, 1, D) table, or a pre-sliced (>=S, D) 2-D table
    (pass it pre-cast to x.dtype to keep the per-step path free of converts)."""
    S, B, D = x.shape
    BD = B * D

    # Small (S, D) pe stream in x.dtype (tiny vs the x slab; no B-broadcast!).
    pe2d = pe[:S, 0, :] if pe.ndim == 3 else pe[:S]
    assert pe2d.shape == (S, D), "pe table shorter than seq_len or d_model mismatch"
    if pe2d.dtype != x.dtype:
        pe2d = pe2d.astype(x.dtype)

    # Lane-dense 2-D slab for x / out (free reshape of contiguous x).
    # B*D % 128 == 0 keeps output stores unmasked vst; smaller/odd B*D still
    # works, just with masked partial stores on the boundary lanes.
    x2d = x.reshape(S, BD)

    # VMEM-sized tile along S: ~block_bytes_target per x block, multiple of 8 rows.
    row_bytes = BD * x.dtype.itemsize
    if tile_s is None:
        tile_s = max(8, (block_bytes_target // max(row_bytes, 1)) // 8 * 8)
    tile_s = max(8, _round_up(int(tile_s), 8))
    tile_s = min(tile_s, _round_up(S, 8))
    # v7x megacore: avoid a 1-program grid (one TensorCore idle) when S allows.
    if pl.cdiv(S, tile_s) < 2 and S > 8:
        tile_s = max(8, _round_up(pl.cdiv(S, 2), 8))
    grid = (pl.cdiv(S, tile_s),)        # boundary (partial) block handled by Pallas

    out_shape = jax.ShapeDtypeStruct((S, BD), x.dtype)
    nbytes = S * BD * x.dtype.itemsize
    pe_bytes = pe2d.size * pe2d.dtype.itemsize
    cost = pl.CostEstimate(flops=3 * S * BD, transcendentals=0,
                           bytes_accessed=2 * nbytes + pe_bytes)
    cparams = pltpu.CompilerParams(
        dimension_semantics=("parallel",),          # v7x: shard grid across both TCs
        vmem_limit_bytes=32 * 1024 * 1024,          # x+out+pe double-buffered ~17 MiB
    )

    if (not training) or p <= 0.0:
        x_block = pl.BlockSpec((tile_s, BD), lambda i: (i, 0))
        pe_block = pl.BlockSpec((tile_s, D), lambda i: (i, 0))
        out2d = pl.pallas_call(
            functools.partial(_pe_add_kernel, B=B),
            out_shape=out_shape,
            grid_spec=pltpu.PrefetchScalarGridSpec(
                num_scalar_prefetch=0, grid=grid,
                in_specs=[x_block, pe_block],
                out_specs=x_block),
            compiler_params=cparams,
            cost_estimate=cost,
            # alias x -> out when the caller no longer needs x (saves an HBM buffer)
            input_output_aliases=({0: 0} if donate_x else {}),
        )(x2d, pe2d)
        return out2d.reshape(S, B, D)

    if p >= 1.0:                        # degenerate dropout: everything dropped
        return jnp.zeros_like(x)

    threshold = min(int(round(p * float(1 << 23))), (1 << 23) - 1)
    scale = 1.0 / (1.0 - p)
    seed_arr = jnp.asarray([seed], dtype=jnp.int32)
    x_block = pl.BlockSpec((tile_s, BD), lambda i, s: (i, 0))
    pe_block = pl.BlockSpec((tile_s, D), lambda i, s: (i, 0))
    out2d = pl.pallas_call(
        functools.partial(_pe_add_dropout_kernel, B=B, BD=BD, tile_s=tile_s,
                          threshold=threshold, scale=scale),
        out_shape=out_shape,
        grid_spec=pltpu.PrefetchScalarGridSpec(
            num_scalar_prefetch=1, grid=grid,
            in_specs=[x_block, pe_block],
            out_specs=x_block),
        compiler_params=cparams,
        cost_estimate=cost,
        input_output_aliases=({1: 0} if donate_x else {}),   # input 0 is the seed
    )(seed_arr, x2d, pe2d)
    return out2d.reshape(S, B, D)


# ----------------------------------------------------------------------------
if __name__ == "__main__":
    key = jax.random.PRNGKey(0)
    S, B, D = 8, 2, 64          # seq_len, batch, d_model  (B*D = 128 -> lane-dense)
    MAX_LEN = 64                # small stand-in for max_len=17520

    x = jax.random.normal(key, (S, B, D), dtype=jnp.float32)
    pe = make_pe_table(MAX_LEN, D)

    # plain-JAX reference
    ref = x + pe[:S]

    # eval-mode forward (dropout == identity)
    out = positional_encoding_forward(x, pe, training=False)
    out = jax.block_until_ready(out)
    assert out.shape == (S, B, D)
    assert jnp.allclose(out, ref, atol=1e-6), "eval-mode mismatch vs reference"

    # training-mode forward: kept elements must equal (x + pe) / (1 - p)
    p = 0.1
    out_tr = positional_encoding_forward(x, pe, p=p, training=True, seed=123)
    out_tr = jax.block_until_ready(out_tr)
    assert out_tr.shape == (S, B, D)
    ref_scaled = ref * jnp.float32(1.0 / (1.0 - p))
    kept = out_tr != 0
    assert jnp.allclose(jnp.where(kept, out_tr - ref_scaled, 0.0), 0.0, atol=1e-5), \
        "training-mode kept values mismatch"
    drop_frac = float(1.0 - jnp.mean(kept.astype(jnp.float32)))
    assert 0.0 < drop_frac < 0.3, f"dropout fraction {drop_frac:.3f} implausible for p={p}"

    print("KERNEL_OK")
</pallas_src>

<mosaic_0001>
module attributes {stable_mosaic.version = 11 : i64} {
  func.func @_pe_add_kernel(%arg0: i32, %arg1: memref<8x128xf32, #tpu.memory_space<vmem>>, %arg2: memref<8x64xf32, #tpu.memory_space<vmem>>, %arg3: memref<8x128xf32, #tpu.memory_space<vmem>>) attributes {dimension_semantics = [#tpu.dimension_semantics<parallel>], iteration_bounds = array<i64: 1>, scalar_prefetch = 0 : i64, scratch_operands = 0 : i64, tpu.core_type = #tpu.core_type<tc>, window_params = [{transform_indices = @transform_0, window_bounds = array<i64: 8, 128>}, {transform_indices = @transform_1, window_bounds = array<i64: 8, 64>}, {transform_indices = @transform_2, window_bounds = array<i64: 8, 128>}]} {
    %c0 = arith.constant 0 : index
    %c0_0 = arith.constant 0 : index
    %0 = vector.load %arg1[%c0, %c0_0] : memref<8x128xf32, #tpu.memory_space<vmem>>, vector<8x128xf32>
    %c0_1 = arith.constant 0 : index
    %c0_2 = arith.constant 0 : index
    %1 = vector.load %arg2[%c0_1, %c0_2] : memref<8x64xf32, #tpu.memory_space<vmem>>, vector<8x64xf32>
    %2 = tpu.concatenate %1, %1 in 1 : vector<8x64xf32>, vector<8x64xf32> -> vector<8x128xf32>
    %3 = arith.addf %0, %2 : vector<8x128xf32>
    %c0_3 = arith.constant 0 : index
    %c0_4 = arith.constant 0 : index
    %4 = vector.load %arg3[%c0_3, %c0_4] : memref<8x128xf32, #tpu.memory_space<vmem>>, vector<8x128xf32>
    tpu.vector_store %arg3[%c0_3, %c0_4], %3 {strides = array<i32>} : memref<8x128xf32, #tpu.memory_space<vmem>>, vector<8x128xf32>,
    return
  }
  func.func @transform_0(%arg0: i32) -> (i32, i32) {
    %c0_i32 = arith.constant 0 : i32
    %c0_i32_0 = arith.constant 0 : i32
    return %arg0, %c0_i32 : i32, i32
  }
  func.func @transform_1(%arg0: i32) -> (i32, i32) {
    %c0_i32 = arith.constant 0 : i32
    %c0_i32_0 = arith.constant 0 : i32
    return %arg0, %c0_i32 : i32, i32
  }
  func.func @transform_2(%arg0: i32) -> (i32, i32) {
    %c0_i32 = arith.constant 0 : i32
    %c0_i32_0 = arith.constant 0 : i32
    return %arg0, %c0_i32 : i32, i32
  }
}

</mosaic_0001>

<bundles_post_ra>
// kernel: tpu_custom_call.1
= control target key start
LH: loop header
LB: loop body
LE: loop exit
PB: predicated region body
PF: predicated region fallthrough
CT: control target
= control target key end

     0   :  { %7 = vsyncpa [#allocation3], 0  ;;  %s160_s0 = inlined_call_operand.hbm [shape: f32[8,128], index: 0, kind: input, shape index: {}]   ;;  %s161_s1 = inlined_call_operand.hbm [shape: f32[8,64], index: 1, kind: input, shape index: {}]   ;;  %s162_s2 = inlined_call_operand.hbm [shape: f32[8,128], index: 2, kind: output, shape index: {}]  }
   0x1   :  { %8 = vsyncpa [#allocation6], 0 }
   0x2   :  { %9 = vsyncpa [#allocation4], 0  ;;  %s132_s9 = smov [#allocation2]   ;;  %s133_s11 = smov [#allocation5]  }
   0x3   :  { %s16_s10 = sshll.u32 %s132_s9, 4  ;;  %s26_s12 = sshll.u32 %s133_s11, 4  ;;  %s17_s10 = int_to_ptr.vmem [resolvable:$true] %s16_s10  ;;  %s27_s12 = int_to_ptr.vmem [resolvable:$true] %s26_s12 }
   0x4   :  { %s74_s13 = scalar_lea.vmem %s17_s10, 128  ;;  %p79_p1 = scmp.lt.s32.totalorder %s17_s10, %s17_s10 }
   0x5   :  { %p75_p0 = scmp.ne.s32.totalorder %s17_s10, %s74_s13  ;;  %p80_p2 = scmp.lt.s32.totalorder %s74_s13, %s74_s13 }
   0x7   :  { %p81_p3 = por %p80_p2, %p79_p1 }
   0x9   :  { %p82_p4 = pnand %p81_p3, %p75_p0 }
   0xb   :  { %85 = shalt.err (!%p82_p4)
}
   0xc   :  { %19 = dma.hbm_to_vmem [thread:$0]  %s160_s0, 128, %s17_s10, [#allocation3]  }
   0xd   :  { %s94_s16 = scalar_lea.vmem %s27_s12, 128  ;;  %p99_p6 = scmp.lt.s32.totalorder %s27_s12, %s27_s12 }
   0xe   :  { %p95_p5 = scmp.ne.s32.totalorder %s27_s12, %s94_s16  ;;  %p100_p7 = scmp.lt.s32.totalorder %s94_s16, %s94_s16 }
  0x10   :  { %p101_p8 = por %p100_p7, %p99_p6 }
  0x12   :  { %p102_p9 = pnand %p101_p8, %p95_p5 }
  0x14   :  { %105 = shalt.err (!%p102_p9)
}
  0x15   :  { %29 = dma.hbm_to_vmem [thread:$0]  %s161_s1, 128, %s27_s12, [#allocation6]  }
  0x16   :  { %126 = dma.done.wait [#allocation3], 128  }
  0x17   :  { %127 = vsyncadd [#allocation3], 4294967168 }
  0x18   :  { %128 = dma.done.wait [#allocation6], 128  }
  0x19   :  { %129 = vsyncadd [#allocation6], 4294967168  ;;  %v37_v0 = vld [vmem:[#allocation5] sm:$0xff]  ;;  %s134_s19 = smov 64   ;;  %vm42_vm0 = vcmask 523264   ;;  %v36_v1 = vld [vmem:[#allocation2] sm:$0xff] }
  0x1a   :  { %39 = vrot.lane.b32.xlu0 %v37_v0, %s134_s19  ;;  %s135_s0 = smov [#allocation7]  }
  0x1b   :  { %s52_s20 = sshll.u32 %s135_s0, 4  ;;  %s53_s20 = int_to_ptr.vmem [resolvable:$true] %s52_s20 }
  0x1c   :  { %s106_s21 = scalar_lea.vmem %s53_s20, 128  ;;  %p111_p11 = scmp.lt.s32.totalorder %s53_s20, %s53_s20 }
  0x1d   :  { %p107_p10 = scmp.ne.s32.totalorder %s53_s20, %s106_s21  ;;  %p112_p12 = scmp.lt.s32.totalorder %s106_s21, %s106_s21 }
  0x1f   :  { %p113_p13 = por %p112_p12, %p111_p11 }
  0x21   :  { %p114_p0 = pnand %p113_p13, %p107_p10 }
  0x8c   :  { %v40_v2 = vpop.permute.xlu0 %39 }
  0x8d   :  { %v43_v3 = vsel %vm42_vm0, %v37_v0, %v40_v2 }
  0x8e   :  { %v44_v4 = vadd.f32 %v43_v3, %v36_v1 }
  0x90   :  { %45 = vst [vmem:[#allocation7] sm:$0xff] %v44_v4 }
  0x91   :  { %117 = shalt.err (!%p114_p0)
}
  0x92   :  { %55 = dma.vmem_to_hbm [thread:$0]  %s53_s20, 128, %s162_s2, [#allocation4]  }
  0x93   :  { %130 = dma.done.wait [#allocation4], 128  }
  0x94   :  { %131 = vsyncadd [#allocation4], 4294967168 }
  0x95   :  { %59 = vsyncpa [#allocation3], 1 }
  0x96   :  { %60 = vsyncpa [#allocation6], 1 }
  0x97   :  { %61 = vsyncpa [#allocation4], 1 }

</bundles_post_ra>
